<compile_context>
chip_gen: v7x
topology: tpu7x:2x2x1
jax: 0.10.0
libtpu: 0.0.40
codegen_flags: <defaults>
</compile_context>

<pallas_src>
import functools

import jax
import jax.numpy as jnp
from jax.experimental import pallas as pl
from jax.experimental.pallas import tpu as pltpu

EPS = 1e-08


def _round_up(x: int, m: int) -> int:
    return ((x + m - 1) // m) * m


def _contrastive_kernel(x_ref, y_ref, out_ref, acc_ref, num_ref, *,
                        n_pad_cols: int):
    """One (block_i, block_j) tile of the contrastive loss.

    x_ref/y_ref: (T, D) pre-normalized (1/temp folded into x) operand tiles.
    out_ref:     (T, 1) per-row log(num) - log(den), written on the last j.
    acc_ref:     (T, 1) VMEM scratch, online sum_j exp(sim_ij).
    num_ref:     (T, 1) VMEM scratch, exp(diag(sim)) extracted on i == j.
    """
    i = pl.program_id(0)
    j = pl.program_id(1)
    nj = pl.num_programs(1)

    # Start of this row block's column sweep: reset the online row-sum.
    @pl.when(j == 0)
    def _():
        acc_ref[...] = jnp.zeros_like(acc_ref)

    # (T, T) similarity tile on the MXU, 'nt' contraction (no explicit y.T).
    # Operands are already normalized + temperature-scaled + cast (bf16 by
    # default); accumulation stays f32 via preferred_element_type.
    sim = jax.lax.dot_general(
        x_ref[...], y_ref[...],
        dimension_numbers=(((1,), (1,)), ((), ())),
        preferred_element_type=jnp.float32)

    e = jnp.exp(sim)

    # No per-tile padding mask: padded y rows are exactly zero, so each padded
    # column contributes exactly exp(0) = 1; the finalize step subtracts the
    # static pad count from the denominator instead.
    acc_ref[...] += jnp.sum(e, axis=1, keepdims=True)

    # Numerator: exp(diag(sim)) lives only in the i == j tile. Extract it from
    # the *same* exp tile that feeds the denominator, so the two are exactly
    # consistent at any MXU precision. Only 1/num_blocks of tiles pay this.
    @pl.when(i == j)
    def _():
        rows = jax.lax.broadcasted_iota(jnp.int32, e.shape, 0)
        cols = jax.lax.broadcasted_iota(jnp.int32, e.shape, 1)
        num_ref[...] = jnp.sum(jnp.where(rows == cols, e, 0.0),
                               axis=1, keepdims=True)

    # End of the column sweep: emit per-row log-ratio terms for this row block.
    @pl.when(j == nj - 1)
    def _():
        num = num_ref[...] + EPS
        den = acc_ref[...] + EPS
        if n_pad_cols:
            den = den - jnp.float32(n_pad_cols)   # remove exp(0)=1 pad terms
        out_ref[...] = jnp.log(num) - jnp.log(den)


def _choose_block(n: int, d: int, block_rows: int, dsize: int) -> int:
    """Square tile size: as requested, rounded to 8, VMEM-budget aware."""
    block = min(block_rows, _round_up(n, 8))
    block = max(8, (block // 8) * 8)
    # Conservative working-set target (~20 MiB): double-buffered x/y input
    # tiles plus a few f32 (T, T) temporaries (sim, exp, iota/select).
    while block > 8 and (4 * block * d * dsize + 4 * block * block * 4) > (20 << 20):
        block = max(8, ((block // 2) // 8) * 8)
    return block


def modality_contrastive_loss(modality1, modality2, cl_temp: float = 0.1, *,
                              block_rows: int = 256,
                              mxu_dtype=jnp.bfloat16):
    """Pallas implementation of ModalityContrastiveLearning.forward.

    mxu_dtype=jnp.bfloat16 (default) feeds the MXU bf16 operands (2-4x MXU
    throughput on v5e/v6e/v7x, halved HBM traffic) with f32 accumulation.
    Pass mxu_dtype=jnp.float32 for exact parity with the PyTorch reference.
    """
    assert modality1.shape == modality2.shape and modality1.ndim == 2
    n, d = modality1.shape
    dsize = jnp.dtype(mxu_dtype).itemsize

    # PyTorch semantics: temp == 0 means "use the raw matmul" (no division).
    inv_temp = 1.0 if float(cl_temp) == 0.0 else 1.0 / float(cl_temp)

    # Row-L2 normalization once, in the wrapper (f32), 1/temp folded into x.
    # This removes all per-tile XLU/EUP/VPU normalization work and lets the
    # kernel stream compact (bf16) pre-normalized operands.
    x = modality1.astype(jnp.float32)
    y = modality2.astype(jnp.float32)
    x_n = (x / (jnp.linalg.norm(x, axis=1, keepdims=True) + EPS)) * inv_temp
    y_n = y / (jnp.linalg.norm(y, axis=1, keepdims=True) + EPS)
    x_n = x_n.astype(mxu_dtype)
    y_n = y_n.astype(mxu_dtype)

    # Square row/col tiles so the diagonal lands entirely in the i == j tile.
    block = _choose_block(n, d, block_rows, dsize)
    n_padded = _round_up(n, block)
    n_pad = n_padded - n
    if n_pad:
        pad = ((0, n_pad), (0, 0))
        # Padded rows are exactly zero -> padded columns contribute exp(0)=1
        # to the denominator, which the kernel subtracts as a constant.
        x_n = jnp.pad(x_n, pad)
        y_n = jnp.pad(y_n, pad)
    num_blocks = n_padded // block

    kernel = functools.partial(_contrastive_kernel, n_pad_cols=n_pad)

    # VMEM budget: double-buffered input tiles + f32 tile temporaries, with
    # headroom; capped at 48 MiB so it stays under v7x's 64 MiB physical VMEM
    # (and well under v5e/v6e's 128 MiB).
    vmem_need = (4 * block * d * dsize          # x, y double-buffered
                 + 6 * block * block * 4        # sim / exp / select temporaries
                 + (2 << 20))                   # misc headroom
    vmem_limit = int(min(max(vmem_need, 32 << 20), 48 << 20))

    cost = pl.CostEstimate(
        flops=int(2 * n_padded * n_padded * d),
        transcendentals=int(n_padded * n_padded),
        bytes_accessed=int(n_padded * d * dsize                 # x streamed once per row block
                           + num_blocks * n_padded * d * dsize  # y re-streamed per row block
                           + n_padded * 4))

    row_log_terms = pl.pallas_call(
        kernel,
        out_shape=jax.ShapeDtypeStruct((n_padded, 1), jnp.float32),
        grid_spec=pltpu.PrefetchScalarGridSpec(
            num_scalar_prefetch=0,
            grid=(num_blocks, num_blocks),
            in_specs=[
                pl.BlockSpec((block, d), lambda i, j: (i, 0)),   # x rows
                pl.BlockSpec((block, d), lambda i, j: (j, 0)),   # y rows (cols of sim)
            ],
            out_specs=pl.BlockSpec((block, 1), lambda i, j: (i, 0)),
            scratch_shapes=[
                pltpu.VMEM((block, 1), jnp.float32),   # online sum_j exp(sim_ij)
                pltpu.VMEM((block, 1), jnp.float32),   # exp(diag(sim)) per row block
            ],
        ),
        compiler_params=pltpu.CompilerParams(
            dimension_semantics=("parallel", "arbitrary"),
            vmem_limit_bytes=vmem_limit),
        cost_estimate=cost,
    )(x_n, y_n)

    # Tiny final reduction over N scalars stays in XLA; padded rows sliced off.
    return -jnp.sum(row_log_terms[:n, 0]) / jnp.float32(n)


def _reference_loss(m1, m2, temp):
    xn = m1 / (jnp.linalg.norm(m1, axis=1, keepdims=True) + EPS)
    yn = m2 / (jnp.linalg.norm(m2, axis=1, keepdims=True) + EPS)
    sim = xn @ yn.T
    if temp != 0.0:
        sim = sim / temp
    num = jnp.exp(jnp.diag(sim)) + EPS
    den = jnp.sum(jnp.exp(sim), axis=1) + EPS
    return -jnp.mean(jnp.log(num / den))


if __name__ == "__main__":
    # Small, deterministic inputs: N=8 samples, D=32 features per modality.
    key = jax.random.PRNGKey(0)
    k1, k2 = jax.random.split(key)
    modality1 = jax.random.normal(k1, (8, 32), dtype=jnp.float32)
    modality2 = jax.random.normal(k2, (8, 32), dtype=jnp.float32)

    ref = _reference_loss(modality1, modality2, 0.1)

    # Default fast path: bf16 MXU operands, f32 accumulation.
    loss_bf16 = modality_contrastive_loss(modality1, modality2, cl_temp=0.1)
    jax.block_until_ready(loss_bf16)
    assert jnp.allclose(loss_bf16, ref, rtol=5e-2, atol=1e-1), (loss_bf16, ref)

    # Exact-parity path.
    loss_f32 = modality_contrastive_loss(modality1, modality2, cl_temp=0.1,
                                         mxu_dtype=jnp.float32)
    jax.block_until_ready(loss_f32)
    assert jnp.allclose(loss_f32, ref, rtol=1e-5, atol=1e-5), (loss_f32, ref)

    # Exercise the tiled path: multiple row/col blocks + row/column padding.
    k3, k4 = jax.random.split(k2)
    m1 = jax.random.normal(k3, (40, 32), dtype=jnp.float32)
    m2 = jax.random.normal(k4, (40, 32), dtype=jnp.float32)
    ref2 = _reference_loss(m1, m2, 0.1)

    loss2_f32 = modality_contrastive_loss(m1, m2, cl_temp=0.1, block_rows=16,
                                          mxu_dtype=jnp.float32)
    jax.block_until_ready(loss2_f32)
    assert jnp.allclose(loss2_f32, ref2, rtol=1e-5, atol=1e-5), (loss2_f32, ref2)

    loss2_bf16 = modality_contrastive_loss(m1, m2, cl_temp=0.1, block_rows=16)
    jax.block_until_ready(loss2_bf16)
    assert jnp.allclose(loss2_bf16, ref2, rtol=5e-2, atol=1e-1), (loss2_bf16, ref2)

    print("KERNEL_OK")
</pallas_src>

<mosaic_0001>
module attributes {stable_mosaic.version = 11 : i64} {
  func.func @_contrastive_kernel(%arg0: i32, %arg1: i32, %arg2: memref<8x32xbf16, #tpu.memory_space<vmem>>, %arg3: memref<8x32xbf16, #tpu.memory_space<vmem>>, %arg4: memref<8x1xf32, #tpu.memory_space<vmem>>, %arg5: memref<8x1xf32, #tpu.memory_space<vmem>>, %arg6: memref<8x1xf32, #tpu.memory_space<vmem>>) attributes {dimension_semantics = [#tpu.dimension_semantics<parallel>, #tpu.dimension_semantics<arbitrary>], iteration_bounds = array<i64: 1, 1>, scalar_prefetch = 0 : i64, scratch_operands = 2 : i64, tpu.core_type = #tpu.core_type<tc>, window_params = [{transform_indices = @transform_0, window_bounds = array<i64: 8, 32>}, {transform_indices = @transform_1, window_bounds = array<i64: 8, 32>}, {transform_indices = @transform_2, window_bounds = array<i64: 8, 1>}]} {
    %c0_i32 = arith.constant 0 : i32
    %0 = arith.cmpi eq, %arg1, %c0_i32 : i32
    %1 = arith.extui %0 : i1 to i32
    %c0_i32_0 = arith.constant 0 : i32
    %2 = arith.cmpi ne, %1, %c0_i32_0 : i32
    scf.if %2 {
      %cst_12 = arith.constant 0.000000e+00 : f32
      %18 = vector.broadcast %cst_12 : f32 to vector<8x1xf32>
      %c0_13 = arith.constant 0 : index
      %c0_14 = arith.constant 0 : index
      %19 = vector.load %arg5[%c0_13, %c0_14] : memref<8x1xf32, #tpu.memory_space<vmem>>, vector<8x1xf32>
      tpu.vector_store %arg5[%c0_13, %c0_14], %18 {strides = array<i32>} : memref<8x1xf32, #tpu.memory_space<vmem>>, vector<8x1xf32>,
    } else {
    }
    %c0 = arith.constant 0 : index
    %c0_1 = arith.constant 0 : index
    %3 = vector.load %arg2[%c0, %c0_1] : memref<8x32xbf16, #tpu.memory_space<vmem>>, vector<8x32xbf16>
    %c0_2 = arith.constant 0 : index
    %c0_3 = arith.constant 0 : index
    %4 = vector.load %arg3[%c0_2, %c0_3] : memref<8x32xbf16, #tpu.memory_space<vmem>>, vector<8x32xbf16>
    %cst = arith.constant dense<0.000000e+00> : vector<8x8xf32>
    %5 = tpu.matmul %3, %4, %cst {dimension_numbers = #tpu.dot_dimension_numbers<[1], [1], [0], [0], [0, 0, 1, 0], [], []>} : vector<8x32xbf16>, vector<8x32xbf16>, vector<8x8xf32> -> vector<8x8xf32>
    %6 = math.exp %5 : vector<8x8xf32>
    %c0_4 = arith.constant 0 : index
    %c0_5 = arith.constant 0 : index
    %7 = vector.load %arg5[%c0_4, %c0_5] : memref<8x1xf32, #tpu.memory_space<vmem>>, vector<8x1xf32>
    %cst_6 = arith.constant dense<0.000000e+00> : vector<8xf32>
    %8 = vector.multi_reduction <add>, %6, %cst_6 [1] : vector<8x8xf32> to vector<8xf32>
    %9 = vector.shape_cast %8 : vector<8xf32> to vector<8x1xf32>
    %10 = arith.addf %7, %9 : vector<8x1xf32>
    %c0_7 = arith.constant 0 : index
    %c0_8 = arith.constant 0 : index
    %11 = vector.load %arg5[%c0_7, %c0_8] : memref<8x1xf32, #tpu.memory_space<vmem>>, vector<8x1xf32>
    tpu.vector_store %arg5[%c0_7, %c0_8], %10 {strides = array<i32>} : memref<8x1xf32, #tpu.memory_space<vmem>>, vector<8x1xf32>,
    %12 = arith.cmpi eq, %arg0, %arg1 : i32
    %13 = arith.extui %12 : i1 to i32
    %c0_i32_9 = arith.constant 0 : i32
    %14 = arith.cmpi ne, %13, %c0_i32_9 : i32
    scf.if %14 {
      %18 = tpu.iota {dimensions = array<i32: 0>} : vector<8x8xi32>
      %19 = tpu.iota {dimensions = array<i32: 1>} : vector<8x8xi32>
      %20 = arith.cmpi eq, %18, %19 : vector<8x8xi32>
      %cst_12 = arith.constant 0.000000e+00 : f32
      %21 = vector.broadcast %cst_12 : f32 to vector<8x8xf32>
      %22 = arith.select %20, %6, %21 : vector<8x8xi1>, vector<8x8xf32>
      %cst_13 = arith.constant dense<0.000000e+00> : vector<8xf32>
      %23 = vector.multi_reduction <add>, %22, %cst_13 [1] : vector<8x8xf32> to vector<8xf32>
      %24 = vector.shape_cast %23 : vector<8xf32> to vector<8x1xf32>
      %c0_14 = arith.constant 0 : index
      %c0_15 = arith.constant 0 : index
      %25 = vector.load %arg6[%c0_14, %c0_15] : memref<8x1xf32, #tpu.memory_space<vmem>>, vector<8x1xf32>
      tpu.vector_store %arg6[%c0_14, %c0_15], %24 {strides = array<i32>} : memref<8x1xf32, #tpu.memory_space<vmem>>, vector<8x1xf32>,
    } else {
    }
    %c0_i32_10 = arith.constant 0 : i32
    %15 = arith.cmpi eq, %arg1, %c0_i32_10 : i32
    %16 = arith.extui %15 : i1 to i32
    %c0_i32_11 = arith.constant 0 : i32
    %17 = arith.cmpi ne, %16, %c0_i32_11 : i32
    scf.if %17 {
      %c0_12 = arith.constant 0 : index
      %c0_13 = arith.constant 0 : index
      %18 = vector.load %arg6[%c0_12, %c0_13] : memref<8x1xf32, #tpu.memory_space<vmem>>, vector<8x1xf32>
      %cst_14 = arith.constant 9.99999993E-9 : f32
      %19 = vector.broadcast %cst_14 : f32 to vector<8x1xf32>
      %20 = arith.addf %18, %19 : vector<8x1xf32>
      %c0_15 = arith.constant 0 : index
      %c0_16 = arith.constant 0 : index
      %21 = vector.load %arg5[%c0_15, %c0_16] : memref<8x1xf32, #tpu.memory_space<vmem>>, vector<8x1xf32>
      %cst_17 = arith.constant 9.99999993E-9 : f32
      %22 = vector.broadcast %cst_17 : f32 to vector<8x1xf32>
      %23 = arith.addf %21, %22 : vector<8x1xf32>
      %24 = math.log %20 : vector<8x1xf32>
      %25 = math.log %23 : vector<8x1xf32>
      %26 = arith.subf %24, %25 : vector<8x1xf32>
      %c0_18 = arith.constant 0 : index
      %c0_19 = arith.constant 0 : index
      %27 = vector.load %arg4[%c0_18, %c0_19] : memref<8x1xf32, #tpu.memory_space<vmem>>, vector<8x1xf32>
      tpu.vector_store %arg4[%c0_18, %c0_19], %26 {strides = array<i32>} : memref<8x1xf32, #tpu.memory_space<vmem>>, vector<8x1xf32>,
    } else {
    }
    return
  }
  func.func @transform_0(%arg0: i32, %arg1: i32) -> (i32, i32) {
    %c0_i32 = arith.constant 0 : i32
    %c0_i32_0 = arith.constant 0 : i32
    return %arg0, %c0_i32 : i32, i32
  }
  func.func @transform_1(%arg0: i32, %arg1: i32) -> (i32, i32) {
    %c0_i32 = arith.constant 0 : i32
    %c0_i32_0 = arith.constant 0 : i32
    return %arg1, %c0_i32 : i32, i32
  }
  func.func @transform_2(%arg0: i32, %arg1: i32) -> (i32, i32) {
    %c0_i32 = arith.constant 0 : i32
    %c0_i32_0 = arith.constant 0 : i32
    return %arg0, %c0_i32 : i32, i32
  }
}

</mosaic_0001>

<bundles_post_ra>
// kernel: tpu_custom_call.1
= control target key start
LH: loop header
LB: loop body
LE: loop exit
PB: predicated region body
PF: predicated region fallthrough
CT: control target
= control target key end

     0   :  { %7 = vsyncpa [#allocation5], 0  ;;  %s251_s0 = inlined_call_operand.hbm [shape: bf16[8,32], index: 0, kind: input, shape index: {}]   ;;  %s252_s1 = inlined_call_operand.hbm [shape: bf16[8,32], index: 1, kind: input, shape index: {}]   ;;  %s253_s2 = inlined_call_operand.vmem [shape: f32[8,1], index: 2, kind: output, shape index: {}]  }
   0x1   :  { %8 = vsyncpa [#allocation7], 0  ;;  %s201_s9 = smov [#allocation4]   ;;  %s202_s11 = smov [#allocation6]  }
   0x2   :  { %s15_s10 = sshll.u32 %s201_s9, 4  ;;  %s25_s12 = sshll.u32 %s202_s11, 4  ;;  %s16_s10 = int_to_ptr.vmem [resolvable:$true] %s15_s10  ;;  %s26_s12 = int_to_ptr.vmem [resolvable:$true] %s25_s12 }
   0x3   :  { %s153_s15 = scalar_lea.hbm %s251_s0, 64 }
   0x4   :  { %p154_p0 = scmp.ne.s32.totalorder %s251_s0, %s153_s15  ;;  %p157_p1 = scmp.lt.u32.totalorder %s153_s15, %s251_s0 }
   0x6   :  { %p159_p2 = pnand %p157_p1, %p154_p0 }
   0x8   :  { %162 = shalt.err (!%p159_p2)
}
   0x9   :  { %s163_s20 = scalar_lea.vmem %s16_s10, 64  ;;  %p168_p4 = scmp.lt.s32.totalorder %s16_s10, %s16_s10 }
   0xa   :  { %p164_p3 = scmp.ne.s32.totalorder %s16_s10, %s163_s20  ;;  %p169_p5 = scmp.lt.s32.totalorder %s163_s20, %s163_s20 }
   0xc   :  { %p170_p6 = por %p169_p5, %p168_p4 }
   0xe   :  { %p171_p7 = pnand %p170_p6, %p164_p3 }
  0x10   :  { %174 = shalt.err (!%p171_p7)
}
  0x11   :  { %18 = dma.hbm_to_vmem [thread:$0]  %s251_s0, 64, %s16_s10, [#allocation5]  }
  0x12   :  { %s175_s25 = scalar_lea.hbm %s252_s1, 64 }
  0x13   :  { %p176_p8 = scmp.ne.s32.totalorder %s252_s1, %s175_s25  ;;  %p179_p9 = scmp.lt.u32.totalorder %s175_s25, %s252_s1 }
  0x15   :  { %p181_p10 = pnand %p179_p9, %p176_p8 }
  0x17   :  { %184 = shalt.err (!%p181_p10)
}
  0x18   :  { %s185_s30 = scalar_lea.vmem %s26_s12, 64  ;;  %p190_p12 = scmp.lt.s32.totalorder %s26_s12, %s26_s12 }
  0x19   :  { %p186_p11 = scmp.ne.s32.totalorder %s26_s12, %s185_s30  ;;  %p191_p13 = scmp.lt.s32.totalorder %s185_s30, %s185_s30 }
  0x1b   :  { %p192_p0 = por %p191_p13, %p190_p12 }
  0x1d   :  { %p193_p1 = pnand %p192_p0, %p186_p11 }
  0x1f   :  { %196 = shalt.err (!%p193_p1)
}
  0x20   :  { %28 = dma.hbm_to_vmem [thread:$0]  %s252_s1, 64, %s26_s12, [#allocation7]  }
  0x21   :  { %197 = dma.done.wait [#allocation5], 64  }
  0x22   :  { %198 = vsyncadd [#allocation5], 4294967232 }
  0x23   :  { %199 = dma.done.wait [#allocation7], 64  }
  0x24   :  { %200 = vsyncadd [#allocation7], 4294967232  ;;  %vm40_vm0 = vcmask 7168   ;;  %v203_v0 = vmov 0.0   ;;  %vm204_vm1 = vmmov 0   ;;  %vm44_vm2 = vcmask 261120  }
  0x25   :  { %41 = vst.msk [vmem:[#allocation2] sm:$0xff] %vm40_vm0, %v203_v0  ;;  %137 = vmatprep.subr.bf16.mxu0 %v203_v0  ;;  %139 = vmatprep.mubr.msk.bf16.mxu0 %vm204_vm1, %v203_v0  ;;  %v43_v1 = vld [vmem:[#allocation6] sm:$0xf]  ;;  %v42_v3 = vld [vmem:[#allocation4] sm:$0xf]  ;;  %v105_v9 = vlaneseq  ;;  %vm94_vm3 = vcmask 64512  }
  0x26   :  { %v49_v2 = vsel %vm44_vm2, %v43_v1, 0 }
  0x27   :  { %138 = vmatpush3.bf16.xpose.msra.mxu0 %v49_v2  ;;  %v106_v10 = vshrl.u32 %v105_v9, 7  ;;  %v108_v11 = vand.u32 127, %v105_v9 }
  0x29   :  { %vm109_vm4 = vcmp.eq.s32.totalorder %v106_v10, %v108_v11 }
  0x2c   :  { %v93_v16 = vld [vmem:[#allocation2] sm:$0xff] }
  0x2e   :  { %140 = vmatmul.mubr.msk.bf16.vlgmr.msra.gmra.mrb[0].mxu0 %vm44_vm2, %v42_v3 }
 0x101   :  { %v85_v4 = vpop.f32.mrb[0].mxu0 }
 0x102   :  { %v91_v5 = vmul.f32 1.442695, %v85_v4  ;;  %v141_v6 = vpop.f32.mrb[1].mxu0 }
 0x103   :  { %v88_v7 = vpop.f32.mrb[2].mxu0 }
 0x104   :  { %147 = vpow2.f32 %v91_v5  ;;  %v142_v8 = vpop.f32.mrb[3].mxu0 }
 0x10e   :  { %v148_v12 = vpop.eup %147 }
 0x10f   :  { %v95_v13 = vsel %vm94_vm3, %v148_v12, 0.0  ;;  %v110_v14 = vsel %vm109_vm4, %v148_v12, 0.0 }
 0x110   :  { %96 = vadd.xlane.f32.xlu0 %v95_v13  ;;  %v111_v15 = vsel %vm94_vm3, %v110_v14, 0.0 }
 0x114   :  { %112 = vadd.xlane.f32.xlu0 %v111_v15 }
 0x19d   :  { %v97_v17 = vpop.xlane.xlu0 %96 }
 0x19e   :  { %v98_v18 = vadd.f32 %v97_v17, %v93_v16 }
 0x1a0   :  { %100 = vst.msk [vmem:[#allocation2] sm:$0xff] %vm40_vm0, %v98_v18 }
 0x1a1   :  { %v113_v19 = vpop.xlane.xlu0 %112 }
 0x1a2   :  { %114 = vst.msk [vmem:[#allocation3] sm:$0xff] %vm40_vm0, %v113_v19 }
 0x1a7   :  { %v120_v20 = vld [vmem:[#allocation2] sm:$0xff] }
 0x1a8   :  { %v121_v21 = vadd.f32 1e-08, %v120_v20 }
 0x1a9   :  { %v118_v22 = vld [vmem:[#allocation3] sm:$0xff] }
 0x1aa   :  { %149 = vlog2.f32 %v121_v21  ;;  %v119_v23 = vadd.f32 1e-08, %v118_v22 }
 0x1ac   :  { %151 = vlog2.f32 %v119_v23 }
 0x1b4   :  { %v150_v24 = vpop.eup %149 }
 0x1b5   :  { %v125_v27 = vmul.f32 0.6931472, %v150_v24 }
 0x1b6   :  { %v152_v25 = vpop.eup %151 }
 0x1b7   :  { %v123_v26 = vmul.f32 0.6931472, %v152_v25 }
 0x1b9   :  { %v126_v28 = vsub.f32 %v123_v26, %v125_v27 }
 0x1bb   :  { %127 = vst.msk [vmem:[%s253_s2] sm:$0xff] %vm40_vm0, %v126_v28 }
 0x1bc   :  { %132 = vsyncpa [#allocation5], 1 }
 0x1bd   :  { %133 = vsyncpa [#allocation7], 1 }

</bundles_post_ra>
